<compile_context>
chip_gen: v6e
topology: v6e:2x2x1
jax: 0.10.0
libtpu: 0.0.40
codegen_flags: <defaults>
</compile_context>

<pallas_src>
import math
import functools

import numpy as np
import jax
import jax.numpy as jnp
from jax import lax
from jax.experimental import pallas as pl
from jax.experimental.pallas import tpu as pltpu


# ---------------------------------------------------------------------------
# Stage 1: fused QKV projection (c_attn), one wide matmul per (batch, T-tile).
# ---------------------------------------------------------------------------
def _qkv_proj_kernel(x_ref, w_ref, b_ref, q_ref, k_ref, v_ref, *, scale):
    x = x_ref[0]                                               # (tt, C)
    qkv = jnp.dot(x, w_ref[...], preferred_element_type=jnp.float32)  # (tt, 3C)
    qkv = qkv + b_ref[...].astype(jnp.float32)
    C = q_ref.shape[-1]
    # Static lane slices (offsets 0, C, 2C); fold 1/sqrt(D) into Q here.
    q_ref[0] = (qkv[:, :C] * scale).astype(q_ref.dtype)
    k_ref[0] = qkv[:, C:2 * C].astype(k_ref.dtype)
    v_ref[0] = qkv[:, 2 * C:].astype(v_ref.dtype)


# ---------------------------------------------------------------------------
# Stage 2: flash attention (online softmax, all heads per step) fused with a
# single full-width c_proj.  Grid = (B, S) where S enumerates only the
# lower-triangular (query-tile i, key-tile kk<=i) pairs via scalar prefetch.
# ---------------------------------------------------------------------------
def _flash_attn_proj_kernel(i_sched_ref, kk_sched_ref,
                            q_ref, k_ref, v_ref, wp_ref, bp_ref, o_ref,
                            m_s, l_s, acc_s,
                            *, n_head, d_head, approx_recip):
    s_idx = pl.program_id(1)
    i = i_sched_ref[s_idx]      # query-tile index
    kk = kk_sched_ref[s_idx]    # key-tile index (kk <= i by construction)
    H, D = n_head, d_head

    @pl.when(kk == 0)
    def _():
        m_s[...] = jnp.full_like(m_s, -jnp.inf)
        l_s[...] = jnp.zeros_like(l_s)
        acc_s[...] = jnp.zeros_like(acc_s)

    q = q_ref[0]                # (tq, C), scale already folded in
    k = k_ref[0]                # (tk, C)
    v = v_ref[0]                # (tk, C)

    def attend(on_diagonal):
        if on_diagonal:
            tq, tk = q.shape[0], k.shape[0]
            # Local mask: with tq == tk and i == kk, global row >= col reduces
            # to the loop-invariant local r >= c.
            rows = lax.broadcasted_iota(jnp.int32, (tq, tk), 0)
            cols = lax.broadcasted_iota(jnp.int32, (tq, tk), 1)
            causal = rows >= cols
        for h in range(H):      # static unroll over heads
            qh = q[:, h * D:(h + 1) * D]
            kh = k[:, h * D:(h + 1) * D]
            vh = v[:, h * D:(h + 1) * D]
            # q @ k^T, contracting last dims (no materialized transpose).
            s = lax.dot_general(qh, kh, (((1,), (1,)), ((), ())),
                                preferred_element_type=jnp.float32)   # (tq, tk)
            if on_diagonal:
                s = jnp.where(causal, s, -1e30)
            m_prev = m_s[h]
            m_new = jnp.maximum(m_prev, jnp.max(s, axis=-1, keepdims=True))
            alpha = jnp.exp(m_prev - m_new)
            p = jnp.exp(s - m_new)
            l_s[h] = alpha * l_s[h] + jnp.sum(p, axis=-1, keepdims=True)
            acc_s[h] = alpha * acc_s[h] + jnp.dot(
                p.astype(vh.dtype), vh, preferred_element_type=jnp.float32)
            m_s[h] = m_new

    @pl.when(kk < i)            # fully-visible tile, no mask
    def _():
        attend(False)

    @pl.when(kk == i)           # diagonal tile: mask, then finalize this query tile
    def _():
        attend(True)
        l = l_s[...]                                            # (H, tq, 1)
        if approx_recip:
            inv = pl.reciprocal(l, approx=True)
        else:
            inv = 1.0 / l
        y = acc_s[...] * inv                                    # (H, tq, D) f32
        # Concatenate heads along lanes -> (tq, C), then ONE c_proj matmul with
        # full contraction depth K = C (MXU-efficient, w_proj fully resident).
        y_cat = jnp.concatenate([y[h] for h in range(H)], axis=-1)
        y_cat = y_cat.astype(wp_ref.dtype)
        out = jnp.dot(y_cat, wp_ref[...], preferred_element_type=jnp.float32)
        out = out + bp_ref[...].astype(jnp.float32)
        o_ref[0] = out.astype(o_ref.dtype)


# ---------------------------------------------------------------------------
# Wrapper
# ---------------------------------------------------------------------------
def causal_self_attention(x, w_attn, b_attn, w_proj, b_proj, *, n_head,
                          block_size=256, compute_dtype=None):
    """x: (B, T, C); w_attn: (C, 3C); b_attn: (1, 3C); w_proj: (C, C);
    b_proj: (1, C).  Weights stored as (in_features, out_features).

    block_size: 256 fills the v6e/v7x 256-wide MXU; use 128 on v5e.
    compute_dtype: optional (e.g. jnp.bfloat16) dtype for the MXU inputs
    (q/k/v storage and the c_proj weight); accumulation stays f32.
    """
    B, T, C = x.shape
    assert C % n_head == 0
    H = n_head
    D = C // H
    scale = 1.0 / math.sqrt(D)
    out_dtype = x.dtype
    cdtype = x.dtype if compute_dtype is None else compute_dtype
    approx_recip = np.dtype(cdtype) != np.dtype(np.float32)

    # Pad T to a multiple of the tile so the tiled flash path always applies
    # (no single-tile fallback).  Padded keys are excluded by the causal mask
    # (they only appear in the last, diagonal key tile); padded query rows are
    # finite garbage that is sliced off below.
    tile = int(block_size)
    Tp = ((T + tile - 1) // tile) * tile
    if Tp != T:
        x = jnp.pad(x, ((0, 0), (0, Tp - T), (0, 0)))

    # ----------------------- stage 1: fused QKV projection ------------------
    t1 = tile
    nt = Tp // t1
    qkv_shape = jax.ShapeDtypeStruct((B, Tp, C), cdtype)
    q, k, v = pl.pallas_call(
        functools.partial(_qkv_proj_kernel, scale=scale),
        out_shape=(qkv_shape, qkv_shape, qkv_shape),
        grid=(B, nt),
        in_specs=[
            pl.BlockSpec((1, t1, C), lambda b, t: (b, t, 0)),       # x tile
            pl.BlockSpec((C, 3 * C), lambda b, t: (0, 0)),          # c_attn weight
            pl.BlockSpec((1, 3 * C), lambda b, t: (0, 0)),          # c_attn bias
        ],
        out_specs=(
            pl.BlockSpec((1, t1, C), lambda b, t: (b, t, 0)),
            pl.BlockSpec((1, t1, C), lambda b, t: (b, t, 0)),
            pl.BlockSpec((1, t1, C), lambda b, t: (b, t, 0)),
        ),
        compiler_params=pltpu.CompilerParams(
            dimension_semantics=("parallel", "parallel"),
            vmem_limit_bytes=32 * 1024 * 1024),
    )(x, w_attn, b_attn)

    # ------------------ stage 2: flash attention + c_proj -------------------
    tq = tk = tile
    nq = Tp // tq

    # Lower-triangular block schedule: only (i, kk<=i) pairs are visited.
    sched_i, sched_kk = [], []
    for qi in range(nq):
        for ki in range(qi + 1):
            sched_i.append(qi)
            sched_kk.append(ki)
    S = len(sched_i)
    sched_i = jnp.asarray(sched_i, dtype=jnp.int32)
    sched_kk = jnp.asarray(sched_kk, dtype=jnp.int32)

    wp = w_proj.astype(cdtype)

    grid_spec = pltpu.PrefetchScalarGridSpec(
        num_scalar_prefetch=2,
        grid=(B, S),
        in_specs=[
            pl.BlockSpec((1, tq, C), lambda b, s, si, sk: (b, si[s], 0)),  # q
            pl.BlockSpec((1, tk, C), lambda b, s, si, sk: (b, sk[s], 0)),  # k
            pl.BlockSpec((1, tk, C), lambda b, s, si, sk: (b, sk[s], 0)),  # v
            pl.BlockSpec((C, C), lambda b, s, si, sk: (0, 0)),             # w_proj
            pl.BlockSpec((1, C), lambda b, s, si, sk: (0, 0)),             # b_proj
        ],
        out_specs=pl.BlockSpec((1, tq, C), lambda b, s, si, sk: (b, si[s], 0)),
        scratch_shapes=[
            pltpu.VMEM((H, tq, 1), jnp.float32),   # running max (per head)
            pltpu.VMEM((H, tq, 1), jnp.float32),   # running denominator
            pltpu.VMEM((H, tq, D), jnp.float32),   # attention accumulator
        ],
    )
    out = pl.pallas_call(
        functools.partial(_flash_attn_proj_kernel, n_head=H, d_head=D,
                          approx_recip=approx_recip),
        grid_spec=grid_spec,
        out_shape=jax.ShapeDtypeStruct((B, Tp, C), out_dtype),
        compiler_params=pltpu.CompilerParams(
            dimension_semantics=("parallel", "arbitrary"),
            vmem_limit_bytes=32 * 1024 * 1024),
    )(sched_i, sched_kk, q, k, v, wp, b_proj)

    return out[:, :T, :] if Tp != T else out


# ---------------------------------------------------------------------------
# Plain-JAX reference (PyTorch forward in eval mode, past_kv=None).
# ---------------------------------------------------------------------------
def reference(x, w_attn, b_attn, w_proj, b_proj, n_head):
    B, T, C = x.shape
    D = C // n_head
    x = x.astype(jnp.float32)
    qkv = jnp.einsum("btc,cd->btd", x, w_attn.astype(jnp.float32)) \
        + b_attn.astype(jnp.float32)[0]
    q, k, v = jnp.split(qkv, 3, axis=-1)

    def heads(t):
        return t.reshape(B, T, n_head, D).transpose(0, 2, 1, 3)

    q, k, v = heads(q), heads(k), heads(v)
    s = jnp.einsum("bhqd,bhkd->bhqk", q, k) / math.sqrt(D)
    mask = jnp.tril(jnp.ones((T, T), dtype=bool))
    s = jnp.where(mask, s, -jnp.inf)
    p = jax.nn.softmax(s, axis=-1)
    y = jnp.einsum("bhqk,bhkd->bhqd", p, v)
    y = y.transpose(0, 2, 1, 3).reshape(B, T, C)
    return jnp.einsum("btc,cd->btd", y, w_proj.astype(jnp.float32)) \
        + b_proj.astype(jnp.float32)[0]


if __name__ == "__main__":
    # T deliberately NOT a multiple of the tile -> exercises the padding path;
    # 4 heads of dim 32, C = 128.
    B, T, C, n_head = 2, 320, 128, 4

    key = jax.random.PRNGKey(0)
    kx, k1, k2, k3, k4 = jax.random.split(key, 5)

    x = jax.random.normal(kx, (B, T, C), dtype=jnp.float32)
    w_attn = jax.random.normal(k1, (C, 3 * C), dtype=jnp.float32) * (1.0 / math.sqrt(C))
    b_attn = jax.random.normal(k2, (1, 3 * C), dtype=jnp.float32) * 0.02
    w_proj = jax.random.normal(k3, (C, C), dtype=jnp.float32) * (1.0 / math.sqrt(C))
    b_proj = jax.random.normal(k4, (1, C), dtype=jnp.float32) * 0.02

    ref = reference(x, w_attn, b_attn, w_proj, b_proj, n_head)

    # float32 run, default 256-wide tiles (v6e/v7x-friendly), exact reciprocal.
    out = causal_self_attention(x, w_attn, b_attn, w_proj, b_proj, n_head=n_head)
    out = jax.block_until_ready(out)
    assert out.shape == (B, T, C)
    err = float(jnp.max(jnp.abs(out - ref)))
    assert jnp.allclose(out, ref, atol=2e-2, rtol=2e-2), f"f32 mismatch, max err {err}"

    # float32 activations with bf16 MXU inputs (f32 accumulation), 128-wide tiles.
    out_c = causal_self_attention(x, w_attn, b_attn, w_proj, b_proj, n_head=n_head,
                                  block_size=128, compute_dtype=jnp.bfloat16)
    out_c = jax.block_until_ready(out_c)
    err_c = float(jnp.max(jnp.abs(out_c - ref)))
    assert jnp.all(jnp.isfinite(out_c)), "bf16-compute output not finite"
    assert jnp.allclose(out_c, ref, atol=2e-1, rtol=2e-1), \
        f"bf16-compute mismatch, max err {err_c}"

    # Native bfloat16 run.
    xb = x.astype(jnp.bfloat16)
    wab, bab = w_attn.astype(jnp.bfloat16), b_attn.astype(jnp.bfloat16)
    wpb, bpb = w_proj.astype(jnp.bfloat16), b_proj.astype(jnp.bfloat16)
    out_b = causal_self_attention(xb, wab, bab, wpb, bpb, n_head=n_head,
                                  block_size=128)
    out_b = jax.block_until_ready(out_b).astype(jnp.float32)
    ref_b = reference(xb, wab, bab, wpb, bpb, n_head)
    err_b = float(jnp.max(jnp.abs(out_b - ref_b)))
    assert jnp.all(jnp.isfinite(out_b)), "bf16 output not finite"
    assert jnp.allclose(out_b, ref_b, atol=2e-1, rtol=2e-1), \
        f"bf16 mismatch, max err {err_b}"

    print("KERNEL_OK")
</pallas_src>

<mosaic_0001>
module attributes {stable_mosaic.version = 11 : i64} {
  func.func @_qkv_proj_kernel(%arg0: i32, %arg1: i32, %arg2: memref<1x256x128xf32, #tpu.memory_space<vmem>>, %arg3: memref<128x384xf32, #tpu.memory_space<vmem>>, %arg4: memref<1x384xf32, #tpu.memory_space<vmem>>, %arg5: memref<1x256x128xf32, #tpu.memory_space<vmem>>, %arg6: memref<1x256x128xf32, #tpu.memory_space<vmem>>, %arg7: memref<1x256x128xf32, #tpu.memory_space<vmem>>) attributes {dimension_semantics = [#tpu.dimension_semantics<parallel>, #tpu.dimension_semantics<parallel>], iteration_bounds = array<i64: 2, 2>, scalar_prefetch = 0 : i64, scratch_operands = 0 : i64, tpu.core_type = #tpu.core_type<tc>, window_params = [{transform_indices = @transform_0, window_bounds = array<i64: 1, 256, 128>}, {pipeline_mode = #tpu.pipeline_mode<synchronous>, transform_indices = @transform_1, window_bounds = array<i64: 128, 384>}, {pipeline_mode = #tpu.pipeline_mode<synchronous>, transform_indices = @transform_2, window_bounds = array<i64: 1, 384>}, {transform_indices = @transform_3, window_bounds = array<i64: 1, 256, 128>}, {transform_indices = @transform_4, window_bounds = array<i64: 1, 256, 128>}, {transform_indices = @transform_5, window_bounds = array<i64: 1, 256, 128>}]} {
    %c0 = arith.constant 0 : index
    %c0_0 = arith.constant 0 : index
    %c0_1 = arith.constant 0 : index
    %0 = vector.load %arg2[%c0, %c0_0, %c0_1] : memref<1x256x128xf32, #tpu.memory_space<vmem>>, vector<1x256x128xf32>
    %1 = vector.shape_cast %0 : vector<1x256x128xf32> to vector<256x128xf32>
    %c0_2 = arith.constant 0 : index
    %c0_3 = arith.constant 0 : index
    %2 = vector.load %arg3[%c0_2, %c0_3] : memref<128x384xf32, #tpu.memory_space<vmem>>, vector<128x384xf32>
    %cst = arith.constant dense<0.000000e+00> : vector<256x384xf32>
    %3 = tpu.matmul %1, %2, %cst {dimension_numbers = #tpu.dot_dimension_numbers<[1], [0], [0], [1], [0, 0, 1, 1], [], []>} : vector<256x128xf32>, vector<128x384xf32>, vector<256x384xf32> -> vector<256x384xf32>
    %c0_4 = arith.constant 0 : index
    %c0_5 = arith.constant 0 : index
    %4 = vector.load %arg4[%c0_4, %c0_5] : memref<1x384xf32, #tpu.memory_space<vmem>>, vector<1x384xf32>
    %5 = vector.broadcast %4 : vector<1x384xf32> to vector<256x384xf32>
    %6 = arith.addf %3, %5 : vector<256x384xf32>
    %7 = vector.extract_strided_slice %6 {offsets = [0, 0], sizes = [256, 128], strides = [1, 1]} : vector<256x384xf32> to vector<256x128xf32>
    %cst_6 = arith.constant 0.176776692 : f32
    %8 = vector.broadcast %cst_6 : f32 to vector<256x128xf32>
    %9 = arith.mulf %7, %8 : vector<256x128xf32>
    %c0_7 = arith.constant 0 : index
    %c0_8 = arith.constant 0 : index
    %c0_9 = arith.constant 0 : index
    %10 = vector.load %arg5[%c0_7, %c0_8, %c0_9] : memref<1x256x128xf32, #tpu.memory_space<vmem>>, vector<1x256x128xf32>
    %11 = vector.shape_cast %10 : vector<1x256x128xf32> to vector<256x128xf32>
    %12 = vector.shape_cast %9 : vector<256x128xf32> to vector<1x256x128xf32>
    tpu.vector_store %arg5[%c0_7, %c0_8, %c0_9], %12 {strides = array<i32>} : memref<1x256x128xf32, #tpu.memory_space<vmem>>, vector<1x256x128xf32>,
    %13 = vector.extract_strided_slice %6 {offsets = [0, 128], sizes = [256, 128], strides = [1, 1]} : vector<256x384xf32> to vector<256x128xf32>
    %c0_10 = arith.constant 0 : index
    %c0_11 = arith.constant 0 : index
    %c0_12 = arith.constant 0 : index
    %14 = vector.load %arg6[%c0_10, %c0_11, %c0_12] : memref<1x256x128xf32, #tpu.memory_space<vmem>>, vector<1x256x128xf32>
    %15 = vector.shape_cast %14 : vector<1x256x128xf32> to vector<256x128xf32>
    %16 = vector.shape_cast %13 : vector<256x128xf32> to vector<1x256x128xf32>
    tpu.vector_store %arg6[%c0_10, %c0_11, %c0_12], %16 {strides = array<i32>} : memref<1x256x128xf32, #tpu.memory_space<vmem>>, vector<1x256x128xf32>,
    %17 = vector.extract_strided_slice %6 {offsets = [0, 256], sizes = [256, 128], strides = [1, 1]} : vector<256x384xf32> to vector<256x128xf32>
    %c0_13 = arith.constant 0 : index
    %c0_14 = arith.constant 0 : index
    %c0_15 = arith.constant 0 : index
    %18 = vector.load %arg7[%c0_13, %c0_14, %c0_15] : memref<1x256x128xf32, #tpu.memory_space<vmem>>, vector<1x256x128xf32>
    %19 = vector.shape_cast %18 : vector<1x256x128xf32> to vector<256x128xf32>
    %20 = vector.shape_cast %17 : vector<256x128xf32> to vector<1x256x128xf32>
    tpu.vector_store %arg7[%c0_13, %c0_14, %c0_15], %20 {strides = array<i32>} : memref<1x256x128xf32, #tpu.memory_space<vmem>>, vector<1x256x128xf32>,
    return
  }
  func.func @transform_0(%arg0: i32, %arg1: i32) -> (i32, i32, i32) {
    %c0_i32 = arith.constant 0 : i32
    %c0_i32_0 = arith.constant 0 : i32
    return %arg0, %arg1, %c0_i32 : i32, i32, i32
  }
  func.func @transform_1(%arg0: i32, %arg1: i32) -> (i32, i32) {
    %c0_i32 = arith.constant 0 : i32
    %c0_i32_0 = arith.constant 0 : i32
    %c0_i32_1 = arith.constant 0 : i32
    return %c0_i32, %c0_i32_0 : i32, i32
  }
  func.func @transform_2(%arg0: i32, %arg1: i32) -> (i32, i32) {
    %c0_i32 = arith.constant 0 : i32
    %c0_i32_0 = arith.constant 0 : i32
    %c0_i32_1 = arith.constant 0 : i32
    return %c0_i32, %c0_i32_0 : i32, i32
  }
  func.func @transform_3(%arg0: i32, %arg1: i32) -> (i32, i32, i32) {
    %c0_i32 = arith.constant 0 : i32
    %c0_i32_0 = arith.constant 0 : i32
    return %arg0, %arg1, %c0_i32 : i32, i32, i32
  }
  func.func @transform_4(%arg0: i32, %arg1: i32) -> (i32, i32, i32) {
    %c0_i32 = arith.constant 0 : i32
    %c0_i32_0 = arith.constant 0 : i32
    return %arg0, %arg1, %c0_i32 : i32, i32, i32
  }
  func.func @transform_5(%arg0: i32, %arg1: i32) -> (i32, i32, i32) {
    %c0_i32 = arith.constant 0 : i32
    %c0_i32_0 = arith.constant 0 : i32
    return %arg0, %arg1, %c0_i32 : i32, i32, i32
  }
}

</mosaic_0001>

<bundles_post_ra>
// kernel: tpu_custom_call.1
= control target key start
LH: loop header
LB: loop body
LE: loop exit
PB: predicated region body
PF: predicated region fallthrough
CT: control target
= control target key end

     0   :  { %s2392_s0 = inlined_call_operand.hbm [shape: f32[2,512,128], index: 0, kind: input, shape index: {}]   ;;  %s2393_s1 = inlined_call_operand.hbm [shape: f32[128,384], index: 1, kind: input, shape index: {}]   ;;  %s2394_s2 = inlined_call_operand.vmem [shape: f32[1,384], index: 2, kind: input, shape index: {}]   ;;  %s2395_s3 = inlined_call_operand.hbm [shape: f32[2,512,128], index: 3, kind: output, shape index: {0}]   ;;  %s2396_s4 = inlined_call_operand.hbm [shape: f32[2,512,128], index: 4, kind: output, shape index: {1}]   ;;  %s2397_s5 = inlined_call_operand.hbm [shape: f32[2,512,128], index: 5, kind: output, shape index: {2}]  }
   0x1   :  { %2405 = sst [smem:[#allocation19_spill]] %s2393_s1 }
   0x2   :  { %2406 = sst [smem:[#allocation20_spill]] %s2395_s3 }
   0x3   :  { %2407 = sst [smem:[#allocation21_spill]] %s2397_s5 }
   0x4   :  { %11 = vsyncpa [#allocation3], 0 }
   0x5   :  { %13 = vsyncpa [#allocation3 + $0x1], 0 }
   0x6   :  { %14 = vsyncpa [#allocation6], 0 }
   0x7   :  { %15 = vsyncpa [#allocation4], 0 }
   0x8   :  { %17 = vsyncpa [#allocation4 + $0x1], 0 }
   0x9   :  { %18 = vsyncpa [#allocation9], 0 }
   0xa   :  { %20 = vsyncpa [#allocation9 + $0x1], 0  ;;  %s1787_s18 = smov 0   ;;  %s1789_s19 = smov 0  }
   0xb   :  { %s1791_s20 = smov 0   ;;  %s1793_s21 = smov 0  }
   0xc   :  { %s1795_s22 = smov 0   ;;  %s1797_s23 = smov 0  }
   0xd   :  { %s1799_s24 = smov 0   ;;  %s1801_s25 = smov 0  }
   0xe LB: > { %2408 = sst [smem:[#allocation15_spill]] %s1715_s18  ;;  %s1828_s26 = sadd.s32 4294967295, %s1743_s25   ;;  %s1743_s25 = sphi %s1801_s25, %s26_s25   ;;  %s1739_s24 = sphi %s1799_s24, %s2432_s24   ;;  %s1735_s23 = sphi %s1797_s23, %s2427_s23   ;;  %s1731_s22 = sphi %s1795_s22, %s2431_s22   ;;  %s1727_s21 = sphi %s1793_s21, %s2426_s21   ;;  %s1723_s20 = sphi %s1791_s20, %s2430_s20   ;;  %s1719_s19 = sphi %s1789_s19, %s2429_s19   ;;  %s1715_s18 = sphi %s1787_s18, %s2428_s18  }
   0xf   : > { %2409 = sst [smem:[#allocation16_spill]] %s1735_s23  ;;  %s2398_s27 = sadd.s32 4294967294, %s1743_s25  }
  0x10   : > { %p60_p0 = scmp.ne.s32.totalorder %s1719_s19, %s1715_s18  ;;  %p61_p1 = scmp.eq.s32.totalorder %s1828_s26, 0 }
  0x11   : > { %p134_p3 = scmp.eq.s32.totalorder %s2398_s27, 3  ;;  %p1240_p5 = scmp.ge.s32.totalorder %s1743_s25, 1 }
  0x12   : > { %p1839_p4 = por %p61_p1, %p60_p0  ;;  %p197_p7 = scmp.lt.s32.totalorder %s1743_s25, 5 }
  0x13   : > { %p1844_p6 = por %p134_p3, %p60_p0  ;;  %s1745_s6 = smov [#allocation5]  }
  0x14   : > { %p1849_p8 = pnand %p1240_p5, %p197_p7  ;;  %s209_s7 = sshll.u32 %s1745_s6, 4  ;;  %s210_s7 = int_to_ptr.vmem [resolvable:$true] %s209_s7 }
  0x15   : > { %s2411_s29 = scalar_select %p1844_p6, 1, 0 }
  0x16   : > { %p1439_p9 = pneg %p1849_p8  ;;  %s1544_s8 = scalar_lea.vmem %s210_s7, 6144 }
  0x17   : > { %2412 = sst [smem:[#allocation17_spill]] %s2411_s29  ;;  %p1545_p12 = scmp.ne.s32.totalorder %s210_s7, %s1544_s8 }
  0x18   : > { %p1440_p10 = pnand %p1439_p9, %p61_p1  ;;  %p1552_p3 = scmp.lt.s32.totalorder %s210_s7, %s210_s7 }
  0x19   : > { %p1553_p2 = scmp.lt.s32.totalorder %s1544_s8, %s1544_s8 }
  0x1a   : > { %p1535_p11 = pneg %p1440_p10 }
  0x1b   : > { %p1554_p6 = por %p1553_p2, %p1552_p3 }
  0x1c   : > { %p1547_p13 = pnand %p1545_p12, %p1535_p11 }
  0x1e   : > { %p1548_p0 = pneg %p1547_p13 }
  0x20   : > { %p1555_p5 = pnand %p1554_p6, %p1548_p0 }
  0x22   : > { %1558 = shalt.err (!%p1555_p5)
}
  0x23   : > { %s1746_s9 = smov 384   ;;  %s1747_s10 = smov 24  }
  0x24   : > { %s2414_s1 = sld [smem:[#allocation19_spill]]  ;;  %s35_s13 = sadd.s32 1, %s1735_s23 }
  0x25   : > { %p36_p2 = scmp.ge.s32.totalorder %s35_s13, 2  ;;  %s38_s14 = sadd.s32 1, %s1739_s24 }
  0x26   : > { %s47_s15 = sadd.s32 1, %s1723_s20  ;;  %p54_p6 = scmp.ne.s32.totalorder %s1723_s20, %s1719_s19 }
  0x27   : > { %s2434_s13 = smov (%p36_p2, %s35_s13), 0  ;;  %s2436_s14 = smov (!%p36_p2, %s38_s14), %s1739_s24 }
  0x28   : > { %2415 = sst [smem:[#allocation18_spill]] %s2434_s13  ;;  %s43_s16 = ssub.s32 %s1735_s23, %s2434_s13 }
  0x29   : > { %p55_p7 = scmp.eq.s32.totalorder %s1743_s25, 0  ;;  %p40_p9 = scmp.ge.s32.totalorder %s2436_s14, 2 }
  0x2a   : > { %1442 = dma.hbm_to_vmem [thread:$0]  (!%p1440_p10), %s2414_s1, 6144, %s210_s7, [#allocation6], %s1746_s9, %s1746_s9, %s1747_s10  }
  0x2b   : > { %p2416_p11 = scmp.eq.s32.totalorder %s1828_s26, 3  ;;  %p1877_p10 = por %p55_p7, %p54_p6 }
  0x2c   : > { %p1458_p13 = scmp.lt.s32.totalorder %s1743_s25, 4  ;;  %s2438_s14 = smov (%p40_p9, %s2436_s14), 0 }
  0x2d   : > { %p1873_p12 = por %p2416_p11, %p54_p6  ;;  %s226_s7 = sand.u32 1, %s1723_s20  }
  0x2e   : > { %s1244_s8 = sshll.u32 %s1735_s23, 5  ;;  %s42_s9 = ssub.s32 %s1739_s24, %s2438_s14 }
  0x2f   : > { %s44_s10 = sor.u32 %s43_s16, %s42_s9  ;;  %s1243_s11 = sshll.u32 %s226_s7, 8 }
  0x30   : > { %p45_p0 = scmp.eq.s32.totalorder %s44_s10, 0  ;;  %s1245_s12 = sshll.u32 %s1739_s24, 6 }
  0x31   : > { %s230_s27 = scalar_lea.vmem [#allocation2], %s1243_s11  ;;  %s236_s29 = sadd.s32 %s1245_s12, %s1244_s8 }
  0x32   : > { %s239_s1 = sshll.u32 %s230_s27, 4  ;;  %s1246_s18 = sshll.u32 %s236_s29, 7  ;;  %s240_s1 = int_to_ptr.vmem [resolvable:$true] %s239_s1 }
  0x33   : > { %s1890_s13 = scalar_select %p45_p0, %s1723_s20, %s47_s15  }
  0x34   : > { %p1896_p3 = pnand %p1458_p13, %p1877_p10  ;;  %s238_s16 = scalar_lea.hbm %s2392_s0, %s1246_s18 }
  0x35   : > { %s227_s9 = scalar_lea.sflag [#allocation3], %s226_s7  ;;  %s1572_s27 = scalar_lea.vmem %s240_s1, 4096 }
  0x36   : > { %p1561_p5 = pneg %p1896_p3  ;;  %p1573_p2 = scmp.ne.s32.totalorder %s240_s1, %s1572_s27 }
  0x37   : > { %s1748_s15 = smov [#allocation2]  }
  0x38   : > { %p1575_p6 = pnand %p1573_p2, %p1561_p5  ;;  %s1577_s29 = sshll.u32 %s1748_s15, 4  ;;  %s1578_s29 = int_to_ptr.vmem [resolvable:$false] %s1577_s29 }
  0x39   : > { %s1579_s6 = scalar_lea.vmem %s1578_s29, 8192  ;;  %p1580_p9 = scmp.lt.s32.totalorder %s240_s1, %s1578_s29 }
  0x3a   : > { %p1576_p7 = pneg %p1575_p6  ;;  %p1581_p11 = scmp.lt.s32.totalorder %s1579_s6, %s1572_s27 }
  0x3c   : > { %p1582_p10 = por %p1581_p11, %p1580_p9 }
  0x3e   : > { %p1583_p13 = pnand %p1582_p10, %p1576_p7 }
  0x40   : > { %1586 = shalt.err (!%p1583_p13)
}
  0x41   : > { %s1749_s8 = smov 128   ;;  %s1750_s3 = smov 8  }
  0x42   : > { %1446 = dma.hbm_to_vmem [thread:$0]  (!%p1896_p3), %s238_s16, 4096, %s240_s1, %s227_s9, %s1749_s8, %s1749_s8, %s1750_s3  }
  0x43   : > { %251 = sbr.rel (%p1849_p8) target bundleno = 461 (0x1cd), region = 32  ;;  %s1910_s18 = sand.u32 (!%p1849_p8), 1, %s1719_s19  }
  0x44   : > { %s1913_s23 = sshll.u32 (!%p1849_p8), %s1910_s18, 8  ;;  %s254_s7 = scalar_lea.sflag (!%p1849_p8), [#allocation3], %s1910_s18 }
  0x45   : > { %s1917_s10 = scalar_lea.vmem (!%p1849_p8), [#allocation2], %s1913_s23 }
  0x48   : > { %1698 = dma.done.wait (%p1839_p4), %s254_s7, 4096  }
  0x49   : > { %1700 = vsyncadd (%p1839_p4), %s254_s7, 4294963200 }
  0x4a   : > { %1702 = dma.done.wait (%p61_p1), [#allocation6], 6144  }
  0x4b   : > { %1704 = vsyncadd (%p61_p1), [#allocation6], 4294961152  ;;  %v1751_v0 = vmov 0.0   ;;  %v380_v1 = vld [vmem:[#allocation5 + $0x170] sm:$0xff]  ;;  %v379_v2 = vld [vmem:[#allocation5 + $0x168] sm:$0xff]  ;;  %s2059_s28 = scalar_lea.vmem [#allocation7], %s1913_s23 }
  0x4c   : > { %463 = vmatprep.mubr.f32.mxu0 %v1751_v0  ;;  %607 = vmatprep.mubr.f32.mxu1 %v1751_v0  ;;  %v377_v3 = vld [vmem:[#allocation5 + $0x158] sm:$0xff]  ;;  %v376_v4 = vld [vmem:[#allocation5 + $0x150] sm:$0xff]  ;;  %v374_v5 = vld [vmem:[#allocation5 + $0x140] sm:$0xff]  ;;  %s2064_s30 = scalar_lea.vmem [#allocation8], %s1913_s23  ;;  %s2132_s11 = scalar_lea.vmem [#allocation10], %s1913_s23 }
  0x4d   : > { %399 = vmatprep.subr.mxu0 %v380_v1  ;;  %1395 = vmatprep.subr.mxu1 %v380_v1  ;;  %v373_v6 = vld [vmem:[#allocation5 + $0x138] sm:$0xff]  ;;  %v371_v7 = vld [vmem:[#allocation5 + $0x128] sm:$0xff]  ;;  %v370_v8 = vld [vmem:[#allocation5 + $0x120] sm:$0xff]  ;;  %s1256_s12 = sshll.u32 %s1727_s21, 5  ;;  %s1257_s16 = sshll.u32 %s1731_s22, 6 }
  0x4e   : > { %400 = vmatpush1.msra.mxu0 %v379_v2  ;;  %1411 = vmatpush1.msra.mxu1 %v379_v2  ;;  %v368_v9 = vld [vmem:[#allocation5 + $0x110] sm:$0xff]  ;;  %v367_v10 = vld [vmem:[#allocation5 + $0x108] sm:$0xff]  ;;  %v365_v11 = vld [vmem:[#allocation5 + $0xf8] sm:$0xff]  ;;  %s1014_s9 = sand.u32 1, %s1828_s26   ;;  %s1032_s27 = sadd.s32 %s1257_s16, %s1256_s12 }
  0x4f   : > { %401 = vmatprep.subr.mxu0 %v377_v3  ;;  %1396 = vmatprep.subr.mxu1 %v377_v3  ;;  %v364_v12 = vld [vmem:[#allocation5 + $0xf0] sm:$0xff]  ;;  %v362_v13 = vld [vmem:[#allocation5 + $0xe0] sm:$0xff]  ;;  %v361_v14 = vld [vmem:[#allocation5 + $0xd8] sm:$0xff]  ;;  %s1258_s21 = sshll.u32 %s1032_s27, 7  ;;  %s1053_s22 = sshll.u32 %s2064_s30, 4  ;;  %s2265_s22 = int_to_ptr.vmem [resolvable:$true] %s1053_s22 }
  0x50   : > { %402 = vmatpush1.msra.mxu0 %v376_v4  ;;  %1412 = vmatpush1.msra.mxu1 %v376_v4  ;;  %v359_v15 = vld [vmem:[#allocation5 + $0xc8] sm:$0xff]  ;;  %v358_v16 = vld [vmem:[#allocation5 + $0xc0] sm:$0xff]  ;;  %v356_v17 = vld [vmem:[#allocation5 + $0xb0] sm:$0xff]  ;;  %s1035_s15 = sshll.u32 %s2059_s28, 4  ;;  %s2261_s8 = scalar_lea.hbm %s2396_s4, %s1258_s21  ;;  %s2274_s15 = int_to_ptr.vmem [resolvable:$true] %s1035_s15 }
  0x51   : > { %403 = vmatprep.subr.mxu0 %v374_v5  ;;  %1397 = vmatprep.subr.mxu1 %v374_v5  ;;  %v355_v18 = vld [vmem:[#allocation5 + $0xa8] sm:$0xff]  ;;  %v353_v19 = vld [vmem:[#allocation5 + $0x98] sm:$0xff]  ;;  %v352_v20 = vld [vmem:[#allocation5 + $0x90] sm:$0xff]  ;;  %s1071_s3 = sshll.u32 %s2132_s11, 4  ;;  %s2421_s16 = sld [smem:[#allocation21_spill]]  ;;  %s2283_s3 = int_to_ptr.vmem [resolvable:$true] %s1071_s3 }
  0x52   : > { %404 = vmatpush1.msra.mxu0 %v373_v6  ;;  %1413 = vmatpush1.msra.mxu1 %v373_v6  ;;  %v350_v21 = vld [vmem:[#allocation5 + $0x80] sm:$0xff]  ;;  %v349_v22 = vld [vmem:[#allocation5 + $0x78] sm:$0xff]  ;;  %v347_v23 = vld [vmem:[#allocation5 + $0x68] sm:$0xff]  ;;  %s2288_s29 = scalar_lea.sflag [#allocation9], %s1014_s9  ;;  %s1587_s6 = scalar_lea.vmem %s2265_s22, 4096 }
  0x53   : > { %405 = vmatprep.subr.mxu0 %v371_v7  ;;  %1398 = vmatprep.subr.mxu1 %v371_v7  ;;  %v346_v24 = vld [vmem:[#allocation5 + $0x60] sm:$0xff]  ;;  %v344_v25 = vld [vmem:[#allocation5 + $0x50] sm:$0xff]  ;;  %v343_v26 = vld [vmem:[#allocation5 + $0x48] sm:$0xff]  ;;  %p1588_p1 = scmp.ne.s32.totalorder %s2265_s22, %s1587_s6  ;;  %s1752_s23 = smov [#allocation8]  }
  0x54   : > { %406 = vmatpush1.msra.mxu0 %v370_v8  ;;  %1414 = vmatpush1.msra.mxu1 %v370_v8  ;;  %v341_v27 = vld [vmem:[#allocation5 + $0x38] sm:$0xff]  ;;  %v340_v28 = vld [vmem:[#allocation5 + $0x30] sm:$0xff]  ;;  %v338_v29 = vld [vmem:[#allocation5 + $0x20] sm:$0xff]  ;;  %s1591_s7 = sshll.u32 %s1752_s23, 4  ;;  %s1592_s7 = int_to_ptr.vmem [resolvable:$false] %s1591_s7 }
  0x55   : > { %407 = vmatprep.subr.mxu0 %v368_v9  ;;  %1399 = vmatprep.subr.mxu1 %v368_v9  ;;  %v337_v30 = vld [vmem:[#allocation5 + $0x18] sm:$0xff]  ;;  %v335_v31 = vld [vmem:[#allocation5 + $0x8] sm:$0xff]  ;;  %v334_v32 = vld [vmem:[#allocation5] sm:$0xff]  ;;  %p1589_p4 = pnand %p1588_p1, %p1873_p12  ;;  %p1594_p0 = scmp.lt.s32.totalorder %s2265_s22, %s1592_s7 }
  0x56   : > { %408 = vmatpush1.msra.mxu0 %v367_v10  ;;  %1415 = vmatpush1.msra.mxu1 %v367_v10  ;;  %v1930_v33 = vld [vmem:[%s1917_s10] sm:$0xff]  ;;  %v381_v35 = vld [vmem:[#allocation5 + $0x178] sm:$0xff]  ;;  %v1939_v37 = vld [vmem:[%s1917_s10 + $0x8] sm:$0xff] }
  0x57   : > { %409 = vmatprep.subr.mxu0 %v365_v11  ;;  %1400 = vmatprep.subr.mxu1 %v365_v11  ;;  %v1933_v34 = vld [vmem:[%s1917_s10 + $0xc0] sm:$0xff]  ;;  %v1943_v38 = vld [vmem:[%s1917_s10 + $0xc8] sm:$0xff]  ;;  %v372_v40 = vld [vmem:[#allocation5 + $0x130] sm:$0xff]  ;;  %s2281_s27 = scalar_lea.hbm %s2421_s16, %s1258_s21  ;;  %p1590_p8 = pneg %p1589_p4 }
  0x58   : > { %410 = vmatpush1.msra.mxu0 %v364_v12  ;;  %1416 = vmatpush1.msra.mxu1 %v364_v12  ;;  %v378_v36 = vld [vmem:[#allocation5 + $0x160] sm:$0xff]  ;;  %v375_v39 = vld [vmem:[#allocation5 + $0x148] sm:$0xff]  ;;  %v1948_v41 = vld [vmem:[%s1917_s10 + $0x10] sm:$0xff] }
  0x59   : > { %411 = vmatprep.subr.mxu0 %v362_v13  ;;  %1401 = vmatprep.subr.mxu1 %v362_v13  ;;  %v1952_v42 = vld [vmem:[%s1917_s10 + $0xd0] sm:$0xff]  ;;  %v369_v43 = vld [vmem:[#allocation5 + $0x118] sm:$0xff]  ;;  %v366_v44 = vld [vmem:[#allocation5 + $0x100] sm:$0xff] }
  0x5a   : > { %412 = vmatpush1.msra.mxu0 %v361_v14  ;;  %1417 = vmatpush1.msra.mxu1 %v361_v14  ;;  %v1958_v45 = vld [vmem:[%s1917_s10 + $0x18] sm:$0xff]  ;;  %v363_v47 = vld [vmem:[#allocation5 + $0xe8] sm:$0xff]  ;;  %v360_v48 = vld [vmem:[#allocation5 + $0xd0] sm:$0xff] }
  0x5b   : > { %413 = vmatprep.subr.mxu0 %v359_v15  ;;  %1402 = vmatprep.subr.mxu1 %v359_v15  ;;  %v1962_v46 = vld [vmem:[%s1917_s10 + $0xd8] sm:$0xff]  ;;  %v306_v49 = vld [vmem:[%s1917_s10 + $0x20] sm:$0xff]  ;;  %v307_v53 = vld [vmem:[%s1917_s10 + $0x28] sm:$0xff] }
  0x5c   : > { %414 = vmatpush1.msra.mxu0 %v358_v16  ;;  %1418 = vmatpush1.msra.mxu1 %v358_v16  ;;  %v1970_v50 = vld [vmem:[%s1917_s10 + $0xe0] sm:$0xff]  ;;  %v357_v51 = vld [vmem:[#allocation5 + $0xb8] sm:$0xff]  ;;  %v1977_v54 = vld [vmem:[%s1917_s10 + $0xe8] sm:$0xff] }
  0x5d   : > { %415 = vmatprep.subr.mxu0 %v356_v17  ;;  %1403 = vmatprep.subr.mxu1 %v356_v17  ;;  %v354_v52 = vld [vmem:[#allocation5 + $0xa0] sm:$0xff]  ;;  %v351_v55 = vld [vmem:[#allocation5 + $0x88] sm:$0xff]  ;;  %v348_v56 = vld [vmem:[#allocation5 + $0x70] sm:$0xff] }
  0x5e   : > { %416 = vmatpush1.msra.mxu0 %v355_v18  ;;  %1419 = vmatpush1.msra.mxu1 %v355_v18  ;;  %v308_v57 = vld [vmem:[%s1917_s10 + $0x30] sm:$0xff]  ;;  %v345_v59 = vld [vmem:[#allocation5 + $0x58] sm:$0xff]  ;;  %v342_v60 = vld [vmem:[#allocation5 + $0x40] sm:$0xff]  ;;  %v384_v18 = vlaneseq }
  0x5f   : > { %417 = vmatprep.subr.mxu0 %v353_v19  ;;  %1404 = vmatprep.subr.mxu1 %v353_v19  ;;  %v1984_v58 = vld [vmem:[%s1917_s10 + $0xf0] sm:$0xff]  ;;  %v309_v61 = vld [vmem:[%s1917_s10 + $0x38] sm:$0xff]  ;;  %v339_v63 = vld [vmem:[#allocation5 + $0x28] sm:$0xff] }
  0x60   : > { %418 = vmatpush1.msra.mxu0 %v352_v20  ;;  %1420 = vmatpush1.msra.mxu1 %v352_v20  ;;  %v1991_v62 = vld [vmem:[%s1917_s10 + $0xf8] sm:$0xff]  ;;  %v336_v1 = vld [vmem:[#allocation5 + $0x10] sm:$0xff]  ;;  %v310_v2 = vld [vmem:[%s1917_s10 + $0x40] sm:$0xff]  ;;  %v2039_v19 = vshrl.u32 %v384_v18, 7 }
  0x61   : > { %419 = vmatprep.subr.mxu0 %v350_v21  ;;  %1405 = vmatprep.subr.mxu1 %v350_v21  ;;  %v311_v3 = vld [vmem:[%s1917_s10 + $0x48] sm:$0xff]  ;;  %v312_v4 = vld [vmem:[%s1917_s10 + $0x50] sm:$0xff]  ;;  %v313_v5 = vld [vmem:[%s1917_s10 + $0x58] sm:$0xff] }
  0x62   : > { %420 = vmatpush1.msra.mxu0 %v349_v22  ;;  %1421 = vmatpush1.msra.mxu1 %v349_v22  ;;  %v314_v6 = vld [vmem:[%s1917_s10 + $0x60] sm:$0xff]  ;;  %v315_v7 = vld [vmem:[%s1917_s10 + $0x68] sm:$0xff]  ;;  %v316_v8 = vld [vmem:[%s1917_s10 + $0x70] sm:$0xff]  ;;  %v386_v20 = vsub.s32 0, %v2039_v19  ;;  %v390_v22 = vsub.s32 1, %v2039_v19 }
  0x63   : > { %421 = vmatprep.subr.mxu0 %v347_v23  ;;  %1406 = vmatprep.subr.mxu1 %v347_v23  ;;  %v317_v9 = vld [vmem:[%s1917_s10 + $0x78] sm:$0xff]  ;;  %v318_v10 = vld [vmem:[%s1917_s10 + $0x80] sm:$0xff]  ;;  %v319_v11 = vld [vmem:[%s1917_s10 + $0x88] sm:$0xff] }
  0x64   : > { %422 = vmatpush1.msra.mxu0 %v346_v24  ;;  %1422 = vmatpush1.msra.mxu1 %v346_v24  ;;  %v320_v12 = vld [vmem:[%s1917_s10 + $0x90] sm:$0xff]  ;;  %v321_v13 = vld [vmem:[%s1917_s10 + $0x98] sm:$0xff]  ;;  %v322_v14 = vld [vmem:[%s1917_s10 + $0xa0] sm:$0xff] }
  0x65   : > { %423 = vmatprep.subr.mxu0 %v344_v25  ;;  %1407 = vmatprep.subr.mxu1 %v344_v25  ;;  %v323_v15 = vld [vmem:[%s1917_s10 + $0xa8] sm:$0xff]  ;;  %v324_v16 = vld [vmem:[%s1917_s10 + $0xb0] sm:$0xff]  ;;  %v325_v17 = vld [vmem:[%s1917_s10 + $0xb8] sm:$0xff]  ;;  %s2420_s10 = sld [smem:[#allocation20_spill]] }
  0x66   : > { %424 = vmatpush1.msra.mxu0 %v343_v26  ;;  %1423 = vmatpush1.msra.mxu1 %v343_v26  ;;  %v2045_v21 = vld [vmem:[%s2394_s2] sm:$0x7] }
  0x67   : > { %425 = vmatprep.subr.mxu0 %v341_v27  ;;  %1408 = vmatprep.subr.mxu1 %v341_v27  ;;  %v2052_v23 = vrot.slane %v2045_v21, %v390_v22 }
  0x68   : > { %426 = vmatpush1.msra.mxu0 %v340_v28  ;;  %1424 = vmatpush1.msra.mxu1 %v340_v28 }
  0x69   : > { %427 = vmatprep.subr.mxu0 %v338_v29  ;;  %1409 = vmatprep.subr.mxu1 %v338_v29 }
  0x6a   : > { %428 = vmatpush1.msra.mxu0 %v337_v30  ;;  %1425 = vmatpush1.msra.mxu1 %v337_v30 }
  0x6b   : > { %429 = vmatprep.subr.mxu0 %v335_v31  ;;  %1410 = vmatprep.subr.mxu1 %v335_v31  ;;  %s2272_s1 = scalar_lea.hbm %s2420_s10, %s1258_s21 }
  0x6c   : > { %430 = vmatpush1.msra.mxu0 %v334_v32  ;;  %1426 = vmatpush1.msra.mxu1 %v334_v32 }
  0x6d   : > { %464 = vmatmul.mubr.f32.vlgmr.msra.gmra.mxu0 %v1930_v33  ;;  %608 = vmatmul.mubr.f32.vlgmr.msra.gmra.mxu1 %v1933_v34 }
  0x6e   : > { %1315 = vmatprep.subr.mxu1 %v381_v35  ;;  %469 = vmatprep.mubr.f32.mxu0 %v1751_v0 }
  0x6f   : > { %1316 = vmatpush3.msra.mxu1 %v381_v35  ;;  %613 = vmatprep.mubr.f32.mxu1 %v1751_v0 }
  0x70   : > { %1317 = vmatprep.subr.mxu1 %v378_v36 }
  0x71   : > { %1318 = vmatpush3.msra.mxu1 %v378_v36  ;;  %470 = vmatmul.mubr.f32.gmra.mxu0 %v1939_v37 }
  0x72   : > { %614 = vmatmul.mubr.f32.gmra.mxu1 %v1943_v38  ;;  %1319 = vmatprep.subr.mxu1 %v375_v39 }
  0x73   : > { %1320 = vmatpush3.msra.mxu1 %v375_v39  ;;  %475 = vmatprep.mubr.f32.mxu0 %v1751_v0 }
  0x74   : > { %1321 = vmatprep.subr.mxu1 %v372_v40  ;;  %619 = vmatprep.mubr.f32.mxu1 %v1751_v0 }
  0x75   : > { %1322 = vmatpush3.msra.mxu1 %v372_v40  ;;  %476 = vmatmul.mubr.f32.gmra.mxu0 %v1948_v41 }
  0x76   : > { %620 = vmatmul.mubr.f32.gmra.mxu1 %v1952_v42  ;;  %1323 = vmatprep.subr.mxu1 %v369_v43 }
  0x77   : > { %1324 = vmatpush3.msra.mxu1 %v369_v43  ;;  %481 = vmatprep.mubr.f32.mxu0 %v1751_v0 }
  0x78   : > { %1325 = vmatprep.subr.mxu1 %v366_v44  ;;  %625 = vmatprep.mubr.f32.mxu1 %v1751_v0 }
  0x79   : > { %1326 = vmatpush3.msra.mxu1 %v366_v44  ;;  %482 = vmatmul.mubr.f32.gmra.mxu0 %v1958_v45 }
  0x7a   : > { %626 = vmatmul.mubr.f32.gmra.mxu1 %v1962_v46  ;;  %1327 = vmatprep.subr.mxu1 %v363_v47 }
  0x7b   : > { %1328 = vmatpush3.msra.mxu1 %v363_v47  ;;  %487 = vmatprep.mubr.f32.mxu0 %v1751_v0 }
  0x7c   : > { %1329 = vmatprep.subr.mxu1 %v360_v48  ;;  %631 = vmatprep.mubr.f32.mxu1 %v1751_v0 }
  0x7d   : > { %1330 = vmatpush3.msra.mxu1 %v360_v48  ;;  %488 = vmatmul.mubr.f32.gmra.mxu0 %v306_v49 }
  0x7e   : > { %632 = vmatmul.mubr.f32.gmra.mxu1 %v1970_v50  ;;  %1331 = vmatprep.subr.mxu1 %v357_v51 }
  0x7f   : > { %1332 = vmatpush3.msra.mxu1 %v357_v51  ;;  %493 = vmatprep.mubr.f32.mxu0 %v1751_v0 }
  0x80   : > { %1333 = vmatprep.subr.mxu1 %v354_v52  ;;  %637 = vmatprep.mubr.f32.mxu1 %v1751_v0 }
  0x81   : > { %1334 = vmatpush3.msra.mxu1 %v354_v52  ;;  %494 = vmatmul.mubr.f32.gmra.mxu0 %v307_v53 }
  0x82   : > { %638 = vmatmul.mubr.f32.gmra.mxu1 %v1977_v54  ;;  %1335 = vmatprep.subr.mxu1 %v351_v55 }
  0x83   : > { %1336 = vmatpush3.msra.mxu1 %v351_v55  ;;  %499 = vmatprep.mubr.f32.mxu0 %v1751_v0 }
  0x84   : > { %1337 = vmatprep.subr.mxu1 %v348_v56  ;;  %643 = vmatprep.mubr.f32.mxu1 %v1751_v0 }
  0x85   : > { %1338 = vmatpush3.msra.mxu1 %v348_v56  ;;  %500 = vmatmul.mubr.f32.gmra.mxu0 %v308_v57 }
  0x86   : > { %644 = vmatmul.mubr.f32.gmra.mxu1 %v1984_v58  ;;  %1339 = vmatprep.subr.mxu1 %v345_v59 }
  0x87   : > { %1340 = vmatpush3.msra.mxu1 %v345_v59  ;;  %505 = vmatprep.mubr.f32.mxu0 %v1751_v0 }
  0x88   : > { %1341 = vmatprep.subr.mxu1 %v342_v60  ;;  %649 = vmatprep.mubr.f32.mxu1 %v1751_v0 }
  0x89   : > { %1342 = vmatpush3.msra.mxu1 %v342_v60  ;;  %506 = vmatmul.mubr.f32.gmra.mxu0 %v309_v61 }
  0x8a   : > { %650 = vmatmul.mubr.f32.gmra.mxu1 %v1991_v62  ;;  %1343 = vmatprep.subr.mxu1 %v339_v63 }
  0x8b   : > { %1344 = vmatpush3.msra.mxu1 %v339_v63  ;;  %511 = vmatprep.mubr.f32.mxu0 %v1751_v0 }
  0x8c   : > { %1345 = vmatprep.subr.mxu1 %v336_v1  ;;  %1347 = vmatprep.mubr.f32.mxu1 %v1930_v33 }
  0x8d   : > { %1346 = vmatpush3.msra.mxu1 %v336_v1  ;;  %512 = vmatmul.mubr.f32.gmra.mxu0 %v310_v2 }
  0x8e   : > { %1348 = vmatmul.mubr.f32.vlgmr.msra.gmra.mxu1 %v1939_v37  ;;  %517 = vmatprep.mubr.f32.mxu0 %v1751_v0 }
  0x8f   : > { %1350 = vmatprep.mubr.f32.mxu1 %v1948_v41 }
  0x91   : > { %518 = vmatmul.mubr.f32.gmra.mxu0 %v311_v3 }
  0x92   : > { %1351 = vmatmul.mubr.f32.gmra.mxu1 %v1958_v45  ;;  %523 = vmatprep.mubr.f32.mxu0 %v1751_v0 }
  0x93   : > { %1353 = vmatprep.mubr.f32.mxu1 %v306_v49 }
  0x95   : > { %524 = vmatmul.mubr.f32.gmra.mxu0 %v312_v4 }
  0x96   : > { %1354 = vmatmul.mubr.f32.gmra.mxu1 %v307_v53  ;;  %529 = vmatprep.mubr.f32.mxu0 %v1751_v0 }
  0x97   : > { %1356 = vmatprep.mubr.f32.mxu1 %v308_v57 }
  0x99   : > { %530 = vmatmul.mubr.f32.gmra.mxu0 %v313_v5 }
  0x9a   : > { %1357 = vmatmul.mubr.f32.gmra.mxu1 %v309_v61  ;;  %535 = vmatprep.mubr.f32.mxu0 %v1751_v0 }
  0x9b   : > { %1359 = vmatprep.mubr.f32.mxu1 %v310_v2 }
  0x9d   : > { %536 = vmatmul.mubr.f32.gmra.mxu0 %v314_v6 }
  0x9e   : > { %1360 = vmatmul.mubr.f32.gmra.mxu1 %v311_v3  ;;  %541 = vmatprep.mubr.f32.mxu0 %v1751_v0 }
  0x9f   : > { %1362 = vmatprep.mubr.f32.mxu1 %v312_v4 }
  0xa1   : > { %542 = vmatmul.mubr.f32.gmra.mxu0 %v315_v7 }
  0xa2   : > { %1363 = vmatmul.mubr.f32.gmra.mxu1 %v313_v5  ;;  %547 = vmatprep.mubr.f32.mxu0 %v1751_v0 }
  0xa3   : > { %1365 = vmatprep.mubr.f32.mxu1 %v314_v6 }
  0xa5   : > { %548 = vmatmul.mubr.f32.gmra.mxu0 %v316_v8 }
  0xa6   : > { %1366 = vmatmul.mubr.f32.gmra.mxu1 %v315_v7  ;;  %553 = vmatprep.mubr.f32.mxu0 %v1751_v0 }
  0xa7   : > { %1368 = vmatprep.mubr.f32.mxu1 %v316_v8 }
  0xa9   : > { %554 = vmatmul.mubr.f32.gmra.mxu0 %v317_v9 }
  0xaa   : > { %1369 = vmatmul.mubr.f32.gmra.mxu1 %v317_v9  ;;  %559 = vmatprep.mubr.f32.mxu0 %v1751_v0 }
  0xab   : > { %1371 = vmatprep.mubr.f32.mxu1 %v318_v10 }
  0xad   : > { %560 = vmatmul.mubr.f32.gmra.mxu0 %v318_v10 }
  0xae   : > { %1372 = vmatmul.mubr.f32.gmra.mxu1 %v319_v11  ;;  %565 = vmatprep.mubr.f32.mxu0 %v1751_v0 }
  0xaf   : > { %1374 = vmatprep.mubr.f32.mxu1 %v320_v12 }
  0xb1   : > { %566 = vmatmul.mubr.f32.gmra.mxu0 %v319_v11 }
  0xb2   : > { %1375 = vmatmul.mubr.f32.gmra.mxu1 %v321_v13  ;;  %571 = vmatprep.mubr.f32.mxu0 %v1751_v0 }
  0xb3   : > { %1377 = vmatprep.mubr.f32.mxu1 %v322_v14 }
  0xb5   : > { %572 = vmatmul.mubr.f32.gmra.mxu0 %v320_v12 }
  0xb6   : > { %1378 = vmatmul.mubr.f32.gmra.mxu1 %v323_v15  ;;  %577 = vmatprep.mubr.f32.mxu0 %v1751_v0 }
  0xb7   : > { %1380 = vmatprep.mubr.f32.mxu1 %v324_v16 }
  0xb9   : > { %578 = vmatmul.mubr.f32.gmra.mxu0 %v321_v13 }
  0xba   : > { %1381 = vmatmul.mubr.f32.gmra.mxu1 %v325_v17  ;;  %583 = vmatprep.mubr.f32.mxu0 %v1751_v0 }
  0xbb   : > { %1383 = vmatprep.mubr.f32.mxu1 %v1933_v34 }
  0xbd   : > { %584 = vmatmul.mubr.f32.gmra.mxu0 %v322_v14 }
  0xbe   : > { %1384 = vmatmul.mubr.f32.gmra.mxu1 %v1943_v38  ;;  %589 = vmatprep.mubr.f32.mxu0 %v1751_v0 }
  0xbf   : > { %1386 = vmatprep.mubr.f32.mxu1 %v1952_v42 }
  0xc1   : > { %590 = vmatmul.mubr.f32.gmra.mxu0 %v323_v15 }
  0xc2   : > { %1387 = vmatmul.mubr.f32.gmra.mxu1 %v1962_v46  ;;  %595 = vmatprep.mubr.f32.mxu0 %v1751_v0 }
  0xc3   : > { %1389 = vmatprep.mubr.f32.mxu1 %v1970_v50 }
  0xc5   : > { %596 = vmatmul.mubr.f32.gmra.mxu0 %v324_v16 }
  0xc6   : > { %1390 = vmatmul.mubr.f32.gmra.mxu1 %v1977_v54  ;;  %601 = vmatprep.mubr.f32.mxu0 %v1751_v0  ;;  %v2049_v0 = vrot.slane %v2045_v21, %v386_v20 }
  0xc7   : > { %1392 = vmatprep.mubr.f32.mxu1 %v1984_v58 }
  0xc9   : > { %602 = vmatmul.mubr.f32.gmra.mxu0 %v325_v17 }
  0xca   : > { %1393 = vmatmul.mubr.f32.gmra.mxu1 %v1991_v62 }
 0x12d   : > { %v465_v24 = vpop.f32.mrf.mxu0  ;;  %v609_v25 = vpop.f32.mrf.mxu1 }
 0x12e   : > { %v466_v26 = vadd.f32 %v465_v24, %v2049_v0  ;;  %v610_v27 = vadd.f32 %v609_v25, %v2049_v0 }
 0x12f   : > { %v467_v28 = vpop.f32.mrf.mxu0  ;;  %v611_v29 = vpop.f32.mrf.mxu1 }
 0x130   : > { %v881_v30 = vmul.f32 0.17677669, %v466_v26  ;;  %v905_v31 = vmul.f32 0.17677669, %v610_v27  ;;  %v468_v32 = vadd.f32 %v467_v28, %v2052_v23  ;;  %v612_v33 = vadd.f32 %v611_v29, %v2052_v23 }
 0x131   : > { %v471_v34 = vpop.f32.mrf.mxu0  ;;  %v394_v29 = vsub.s32 2, %v2039_v19 }
 0x132   : > { %913 = vst [vmem:[%s2059_s28] sm:$0xff] %v881_v30  ;;  %937 = vst [vmem:[%s2059_s28 + $0xc0] sm:$0xff] %v905_v31  ;;  %v472_v35 = vadd.f32 %v471_v34, %v2049_v0  ;;  %v615_v36 = vpop.f32.mrf.mxu1 }
 0x133   : > { %945 = vst [vmem:[%s2064_s30] sm:$0xff] %v468_v32  ;;  %969 = vst [vmem:[%s2064_s30 + $0xc0] sm:$0xff] %v612_v33  ;;  %v616_v37 = vadd.f32 %v615_v36, %v2049_v0  ;;  %v473_v38 = vpop.f32.mrf.mxu0 }
 0x134   : > { %v882_v39 = vmul.f32 0.17677669, %v472_v35  ;;  %v474_v40 = vadd.f32 %v473_v38, %v2052_v23  ;;  %v617_v41 = vpop.f32.mrf.mxu1 }
 0x135   : > { %v906_v42 = vmul.f32 0.17677669, %v616_v37  ;;  %v618_v43 = vadd.f32 %v617_v41, %v2052_v23  ;;  %v477_v44 = vpop.f32.mrf.mxu0 }
 0x136   : > { %914 = vst [vmem:[%s2059_s28 + $0x8] sm:$0xff] %v882_v39  ;;  %946 = vst [vmem:[%s2064_s30 + $0x8] sm:$0xff] %v474_v40  ;;  %v478_v45 = vadd.f32 %v477_v44, %v2049_v0  ;;  %v621_v46 = vpop.f32.mrf.mxu1  ;;  %v2120_v39 = vrot.slane %v2045_v21, %v394_v29 }
 0x137   : > { %938 = vst [vmem:[%s2059_s28 + $0xc8] sm:$0xff] %v906_v42  ;;  %970 = vst [vmem:[%s2064_s30 + $0xc8] sm:$0xff] %v618_v43  ;;  %v622_v47 = vadd.f32 %v621_v46, %v2049_v0  ;;  %v479_v48 = vpop.f32.mrf.mxu0 }
 0x138   : > { %v883_v49 = vmul.f32 0.17677669, %v478_v45  ;;  %v480_v50 = vadd.f32 %v479_v48, %v2052_v23  ;;  %v623_v51 = vpop.f32.mrf.mxu1 }
 0x139   : > { %v907_v52 = vmul.f32 0.17677669, %v622_v47  ;;  %v624_v53 = vadd.f32 %v623_v51, %v2052_v23  ;;  %v483_v54 = vpop.f32.mrf.mxu0 }
 0x13a   : > { %915 = vst [vmem:[%s2059_s28 + $0x10] sm:$0xff] %v883_v49  ;;  %947 = vst [vmem:[%s2064_s30 + $0x10] sm:$0xff] %v480_v50  ;;  %v484_v55 = vadd.f32 %v483_v54, %v2049_v0  ;;  %v627_v56 = vpop.f32.mrf.mxu1 }
 0x13b   : > { %939 = vst [vmem:[%s2059_s28 + $0xd0] sm:$0xff] %v907_v52  ;;  %971 = vst [vmem:[%s2064_s30 + $0xd0] sm:$0xff] %v624_v53  ;;  %v628_v57 = vadd.f32 %v627_v56, %v2049_v0  ;;  %v485_v58 = vpop.f32.mrf.mxu0 }
 0x13c   : > { %v884_v59 = vmul.f32 0.17677669, %v484_v55  ;;  %v486_v60 = vadd.f32 %v485_v58, %v2052_v23  ;;  %v629_v61 = vpop.f32.mrf.mxu1 }
 0x13d   : > { %v908_v62 = vmul.f32 0.17677669, %v628_v57  ;;  %v630_v63 = vadd.f32 %v629_v61, %v2052_v23  ;;  %v489_v1 = vpop.f32.mrf.mxu0 }
 0x13e   : > { %916 = vst [vmem:[%s2059_s28 + $0x18] sm:$0xff] %v884_v59  ;;  %948 = vst [vmem:[%s2064_s30 + $0x18] sm:$0xff] %v486_v60  ;;  %v490_v2 = vadd.f32 %v489_v1, %v2049_v0  ;;  %v633_v3 = vpop.f32.mrf.mxu1 }
 0x13f   : > { %940 = vst [vmem:[%s2059_s28 + $0xd8] sm:$0xff] %v908_v62  ;;  %972 = vst [vmem:[%s2064_s30 + $0xd8] sm:$0xff] %v630_v63  ;;  %v634_v4 = vadd.f32 %v633_v3, %v2049_v0  ;;  %v491_v5 = vpop.f32.mrf.mxu0 }
 0x140   : > { %v885_v6 = vmul.f32 0.17677669, %v490_v2  ;;  %v492_v7 = vadd.f32 %v491_v5, %v2052_v23  ;;  %v635_v8 = vpop.f32.mrf.mxu1 }
 0x141   : > { %v909_v9 = vmul.f32 0.17677669, %v634_v4  ;;  %v636_v10 = vadd.f32 %v635_v8, %v2052_v23  ;;  %v495_v11 = vpop.f32.mrf.mxu0 }
 0x142   : > { %917 = vst [vmem:[%s2059_s28 + $0x20] sm:$0xff] %v885_v6  ;;  %949 = vst [vmem:[%s2064_s30 + $0x20] sm:$0xff] %v492_v7  ;;  %v496_v12 = vadd.f32 %v495_v11, %v2049_v0  ;;  %v639_v13 = vpop.f32.mrf.mxu1 }
 0x143   : > { %941 = vst [vmem:[%s2059_s28 + $0xe0] sm:$0xff] %v909_v9  ;;  %973 = vst [vmem:[%s2064_s30 + $0xe0] sm:$0xff] %v636_v10  ;;  %v640_v14 = vadd.f32 %v639_v13, %v2049_v0  ;;  %v497_v15 = vpop.f32.mrf.mxu0 }
 0x144   : > { %v886_v16 = vmul.f32 0.17677669, %v496_v12  ;;  %v498_v17 = vadd.f32 %v497_v15, %v2052_v23  ;;  %v641_v18 = vpop.f32.mrf.mxu1 }
 0x145   : > { %v910_v20 = vmul.f32 0.17677669, %v640_v14  ;;  %v642_v22 = vadd.f32 %v641_v18, %v2052_v23  ;;  %v501_v24 = vpop.f32.mrf.mxu0 }
 0x146   : > { %918 = vst [vmem:[%s2059_s28 + $0x28] sm:$0xff] %v886_v16  ;;  %950 = vst [vmem:[%s2064_s30 + $0x28] sm:$0xff] %v498_v17  ;;  %v502_v25 = vadd.f32 %v501_v24, %v2049_v0  ;;  %v645_v26 = vpop.f32.mrf.mxu1 }
 0x147   : > { %942 = vst [vmem:[%s2059_s28 + $0xe8] sm:$0xff] %v910_v20  ;;  %974 = vst [vmem:[%s2064_s30 + $0xe8] sm:$0xff] %v642_v22  ;;  %v646_v27 = vadd.f32 %v645_v26, %v2049_v0  ;;  %v503_v28 = vpop.f32.mrf.mxu0 }
 0x148   : > { %v887_v30 = vmul.f32 0.17677669, %v502_v25  ;;  %v504_v31 = vadd.f32 %v503_v28, %v2052_v23  ;;  %v647_v32 = vpop.f32.mrf.mxu1 }
 0x149   : > { %v911_v33 = vmul.f32 0.17677669, %v646_v27  ;;  %v648_v34 = vadd.f32 %v647_v32, %v2052_v23  ;;  %v507_v35 = vpop.f32.mrf.mxu0 }
 0x14a   : > { %919 = vst [vmem:[%s2059_s28 + $0x30] sm:$0xff] %v887_v30  ;;  %951 = vst [vmem:[%s2064_s30 + $0x30] sm:$0xff] %v504_v31  ;;  %v508_v36 = vadd.f32 %v507_v35, %v2049_v0  ;;  %v651_v37 = vpop.f32.mrf.mxu1 }
 0x14b   : > { %943 = vst [vmem:[%s2059_s28 + $0xf0] sm:$0xff] %v911_v33  ;;  %975 = vst [vmem:[%s2064_s30 + $0xf0] sm:$0xff] %v648_v34  ;;  %v652_v19 = vadd.f32 %v651_v37, %v2049_v0  ;;  %v509_v38 = vpop.f32.mrf.mxu0 }
 0x14c   : > { %v888_v40 = vmul.f32 0.17677669, %v508_v36  ;;  %v510_v41 = vadd.f32 %v509_v38, %v2052_v23  ;;  %v653_v42 = vpop.f32.mrf.mxu1 }
 0x14d   : > { %v912_v43 = vmul.f32 0.17677669, %v652_v19  ;;  %v654_v44 = vadd.f32 %v653_v42, %v2052_v23  ;;  %v513_v45 = vpop.f32.mrf.mxu0 }
 0x14e   : > { %920 = vst [vmem:[%s2059_s28 + $0x38] sm:$0xff] %v888_v40  ;;  %952 = vst [vmem:[%s2064_s30 + $0x38] sm:$0xff] %v510_v41  ;;  %v514_v46 = vadd.f32 %v513_v45, %v2049_v0  ;;  %v1349_v47 = vpop.f32.mrf.mxu1 }
 0x14f   : > { %944 = vst [vmem:[%s2059_s28 + $0xf8] sm:$0xff] %v912_v43  ;;  %976 = vst [vmem:[%s2064_s30 + $0xf8] sm:$0xff] %v654_v44  ;;  %v728_v21 = vadd.f32 %v1349_v47, %v2120_v39  ;;  %v515_v48 = vpop.f32.mrf.mxu0 }
 0x150   : > { %v889_v49 = vmul.f32 0.17677669, %v514_v46  ;;  %v516_v50 = vadd.f32 %v515_v48, %v2052_v23  ;;  %v722_v51 = vpop.f32.mrf.mxu1 }
 0x151   : > { %978 = vst [vmem:[%s2132_s11 + $0x8] sm:$0xff] %v728_v21  ;;  %v723_v52 = vadd.f32 %v722_v51, %v2120_v39  ;;  %v519_v53 = vpop.f32.mrf.mxu0 }
 0x152   : > { %921 = vst [vmem:[%s2059_s28 + $0x40] sm:$0xff] %v889_v49  ;;  %953 = vst [vmem:[%s2064_s30 + $0x40] sm:$0xff] %v516_v50  ;;  %v520_v54 = vadd.f32 %v519_v53, %v2049_v0  ;;  %v1352_v55 = vpop.f32.mrf.mxu1 }
 0x153   : > { %977 = vst [vmem:[%s2132_s11] sm:$0xff] %v723_v52  ;;  %v738_v56 = vadd.f32 %v1352_v55, %v2120_v39  ;;  %v521_v57 = vpop.f32.mrf.mxu0 }
 0x154   : > { %v890_v58 = vmul.f32 0.17677669, %v520_v54  ;;  %v522_v59 = vadd.f32 %v521_v57, %v2052_v23  ;;  %v732_v60 = vpop.f32.mrf.mxu1 }
 0x155   : > { %980 = vst [vmem:[%s2132_s11 + $0x18] sm:$0xff] %v738_v56  ;;  %v733_v61 = vadd.f32 %v732_v60, %v2120_v39  ;;  %v525_v62 = vpop.f32.mrf.mxu0 }
 0x156   : > { %922 = vst [vmem:[%s2059_s28 + $0x48] sm:$0xff] %v890_v58  ;;  %954 = vst [vmem:[%s2064_s30 + $0x48] sm:$0xff] %v522_v59  ;;  %v526_v63 = vadd.f32 %v525_v62, %v2049_v0  ;;  %v1355_v1 = vpop.f32.mrf.mxu1 }
 0x157   : > { %979 = vst [vmem:[%s2132_s11 + $0x10] sm:$0xff] %v733_v61  ;;  %v748_v2 = vadd.f32 %v1355_v1, %v2120_v39  ;;  %v527_v3 = vpop.f32.mrf.mxu0 }
 0x158   : > { %v891_v4 = vmul.f32 0.17677669, %v526_v63  ;;  %v528_v5 = vadd.f32 %v527_v3, %v2052_v23  ;;  %v742_v6 = vpop.f32.mrf.mxu1 }
 0x159   : > { %982 = vst [vmem:[%s2132_s11 + $0x28] sm:$0xff] %v748_v2  ;;  %v743_v7 = vadd.f32 %v742_v6, %v2120_v39  ;;  %v531_v8 = vpop.f32.mrf.mxu0 }
 0x15a   : > { %923 = vst [vmem:[%s2059_s28 + $0x50] sm:$0xff] %v891_v4  ;;  %955 = vst [vmem:[%s2064_s30 + $0x50] sm:$0xff] %v528_v5  ;;  %v532_v9 = vadd.f32 %v531_v8, %v2049_v0  ;;  %v1358_v10 = vpop.f32.mrf.mxu1 }
 0x15b   : > { %981 = vst [vmem:[%s2132_s11 + $0x20] sm:$0xff] %v743_v7  ;;  %v758_v11 = vadd.f32 %v1358_v10, %v2120_v39  ;;  %v533_v12 = vpop.f32.mrf.mxu0 }
 0x15c   : > { %v892_v13 = vmul.f32 0.17677669, %v532_v9  ;;  %v534_v14 = vadd.f32 %v533_v12, %v2052_v23  ;;  %v752_v15 = vpop.f32.mrf.mxu1 }
 0x15d   : > { %984 = vst [vmem:[%s2132_s11 + $0x38] sm:$0xff] %v758_v11  ;;  %v753_v16 = vadd.f32 %v752_v15, %v2120_v39  ;;  %v537_v17 = vpop.f32.mrf.mxu0 }
 0x15e   : > { %924 = vst [vmem:[%s2059_s28 + $0x58] sm:$0xff] %v892_v13  ;;  %956 = vst [vmem:[%s2064_s30 + $0x58] sm:$0xff] %v534_v14  ;;  %v538_v18 = vadd.f32 %v537_v17, %v2049_v0  ;;  %v1361_v20 = vpop.f32.mrf.mxu1 }
 0x15f   : > { %983 = vst [vmem:[%s2132_s11 + $0x30] sm:$0xff] %v753_v16  ;;  %v768_v22 = vadd.f32 %v1361_v20, %v2120_v39  ;;  %v539_v24 = vpop.f32.mrf.mxu0 }
 0x160   : > { %v893_v25 = vmul.f32 0.17677669, %v538_v18  ;;  %v540_v26 = vadd.f32 %v539_v24, %v2052_v23  ;;  %v762_v27 = vpop.f32.mrf.mxu1 }
 0x161   : > { %986 = vst [vmem:[%s2132_s11 + $0x48] sm:$0xff] %v768_v22  ;;  %v763_v28 = vadd.f32 %v762_v27, %v2120_v39  ;;  %v543_v29 = vpop.f32.mrf.mxu0 }
 0x162   : > { %925 = vst [vmem:[%s2059_s28 + $0x60] sm:$0xff] %v893_v25  ;;  %957 = vst [vmem:[%s2064_s30 + $0x60] sm:$0xff] %v540_v26  ;;  %v544_v30 = vadd.f32 %v543_v29, %v2049_v0  ;;  %v1364_v31 = vpop.f32.mrf.mxu1 }
 0x163   : > { %985 = vst [vmem:[%s2132_s11 + $0x40] sm:$0xff] %v763_v28  ;;  %v778_v32 = vadd.f32 %v1364_v31, %v2120_v39  ;;  %v545_v33 = vpop.f32.mrf.mxu0 }
 0x164   : > { %v894_v34 = vmul.f32 0.17677669, %v544_v30  ;;  %v546_v35 = vadd.f32 %v545_v33, %v2052_v23  ;;  %v772_v36 = vpop.f32.mrf.mxu1 }
 0x165   : > { %988 = vst [vmem:[%s2132_s11 + $0x58] sm:$0xff] %v778_v32  ;;  %v773_v37 = vadd.f32 %v772_v36, %v2120_v39  ;;  %v549_v19 = vpop.f32.mrf.mxu0 }
 0x166   : > { %926 = vst [vmem:[%s2059_s28 + $0x68] sm:$0xff] %v894_v34  ;;  %958 = vst [vmem:[%s2064_s30 + $0x68] sm:$0xff] %v546_v35  ;;  %v550_v38 = vadd.f32 %v549_v19, %v2049_v0  ;;  %v1367_v40 = vpop.f32.mrf.mxu1 }
 0x167   : > { %987 = vst [vmem:[%s2132_s11 + $0x50] sm:$0xff] %v773_v37  ;;  %v788_v41 = vadd.f32 %v1367_v40, %v2120_v39  ;;  %v551_v42 = vpop.f32.mrf.mxu0 }
 0x168   : > { %v895_v43 = vmul.f32 0.17677669, %v550_v38  ;;  %v552_v44 = vadd.f32 %v551_v42, %v2052_v23  ;;  %v782_v45 = vpop.f32.mrf.mxu1 }
 0x169   : > { %990 = vst [vmem:[%s2132_s11 + $0x68] sm:$0xff] %v788_v41  ;;  %v783_v46 = vadd.f32 %v782_v45, %v2120_v39  ;;  %v555_v47 = vpop.f32.mrf.mxu0 }
 0x16a   : > { %927 = vst [vmem:[%s2059_s28 + $0x70] sm:$0xff] %v895_v43  ;;  %959 = vst [vmem:[%s2064_s30 + $0x70] sm:$0xff] %v552_v44  ;;  %v556_v21 = vadd.f32 %v555_v47, %v2049_v0  ;;  %v1370_v48 = vpop.f32.mrf.mxu1 }
 0x16b   : > { %989 = vst [vmem:[%s2132_s11 + $0x60] sm:$0xff] %v783_v46  ;;  %v798_v49 = vadd.f32 %v1370_v48, %v2120_v39  ;;  %v557_v50 = vpop.f32.mrf.mxu0 }
 0x16c   : > { %v896_v51 = vmul.f32 0.17677669, %v556_v21  ;;  %v558_v52 = vadd.f32 %v557_v50, %v2052_v23  ;;  %v792_v53 = vpop.f32.mrf.mxu1 }
 0x16d   : > { %992 = vst [vmem:[%s2132_s11 + $0x78] sm:$0xff] %v798_v49  ;;  %v793_v54 = vadd.f32 %v792_v53, %v2120_v39  ;;  %v561_v55 = vpop.f32.mrf.mxu0 }
 0x16e   : > { %928 = vst [vmem:[%s2059_s28 + $0x78] sm:$0xff] %v896_v51  ;;  %960 = vst [vmem:[%s2064_s30 + $0x78] sm:$0xff] %v558_v52  ;;  %v562_v56 = vadd.f32 %v561_v55, %v2049_v0  ;;  %v1373_v57 = vpop.f32.mrf.mxu1 }
 0x16f   : > { %991 = vst [vmem:[%s2132_s11 + $0x70] sm:$0xff] %v793_v54  ;;  %v808_v58 = vadd.f32 %v1373_v57, %v2120_v39  ;;  %v563_v59 = vpop.f32.mrf.mxu0 }
 0x170   : > { %v897_v60 = vmul.f32 0.17677669, %v562_v56  ;;  %v564_v61 = vadd.f32 %v563_v59, %v2052_v23  ;;  %v802_v62 = vpop.f32.mrf.mxu1 }
 0x171   : > { %994 = vst [vmem:[%s2132_s11 + $0x88] sm:$0xff] %v808_v58  ;;  %v803_v63 = vadd.f32 %v802_v62, %v2120_v39  ;;  %v567_v1 = vpop.f32.mrf.mxu0 }
 0x172   : > { %929 = vst [vmem:[%s2059_s28 + $0x80] sm:$0xff] %v897_v60  ;;  %961 = vst [vmem:[%s2064_s30 + $0x80] sm:$0xff] %v564_v61  ;;  %v568_v2 = vadd.f32 %v567_v1, %v2049_v0  ;;  %v1376_v3 = vpop.f32.mrf.mxu1 }
 0x173   : > { %993 = vst [vmem:[%s2132_s11 + $0x80] sm:$0xff] %v803_v63  ;;  %v818_v4 = vadd.f32 %v1376_v3, %v2120_v39  ;;  %v569_v5 = vpop.f32.mrf.mxu0 }
 0x174   : > { %v898_v6 = vmul.f32 0.17677669, %v568_v2  ;;  %v570_v7 = vadd.f32 %v569_v5, %v2052_v23  ;;  %v812_v8 = vpop.f32.mrf.mxu1 }
 0x175   : > { %996 = vst [vmem:[%s2132_s11 + $0x98] sm:$0xff] %v818_v4  ;;  %v813_v9 = vadd.f32 %v812_v8, %v2120_v39  ;;  %v573_v10 = vpop.f32.mrf.mxu0 }
 0x176   : > { %930 = vst [vmem:[%s2059_s28 + $0x88] sm:$0xff] %v898_v6  ;;  %962 = vst [vmem:[%s2064_s30 + $0x88] sm:$0xff] %v570_v7  ;;  %v574_v11 = vadd.f32 %v573_v10, %v2049_v0  ;;  %v1379_v12 = vpop.f32.mrf.mxu1 }
 0x177   : > { %995 = vst [vmem:[%s2132_s11 + $0x90] sm:$0xff] %v813_v9  ;;  %v828_v13 = vadd.f32 %v1379_v12, %v2120_v39  ;;  %v575_v14 = vpop.f32.mrf.mxu0 }
 0x178   : > { %v899_v15 = vmul.f32 0.17677669, %v574_v11  ;;  %v576_v16 = vadd.f32 %v575_v14, %v2052_v23  ;;  %v822_v17 = vpop.f32.mrf.mxu1 }
 0x179   : > { %998 = vst [vmem:[%s2132_s11 + $0xa8] sm:$0xff] %v828_v13  ;;  %v823_v18 = vadd.f32 %v822_v17, %v2120_v39  ;;  %v579_v20 = vpop.f32.mrf.mxu0 }
 0x17a   : > { %931 = vst [vmem:[%s2059_s28 + $0x90] sm:$0xff] %v899_v15  ;;  %963 = vst [vmem:[%s2064_s30 + $0x90] sm:$0xff] %v576_v16  ;;  %v580_v22 = vadd.f32 %v579_v20, %v2049_v0  ;;  %v1382_v24 = vpop.f32.mrf.mxu1 }
 0x17b   : > { %997 = vst [vmem:[%s2132_s11 + $0xa0] sm:$0xff] %v823_v18  ;;  %v838_v25 = vadd.f32 %v1382_v24, %v2120_v39  ;;  %v581_v26 = vpop.f32.mrf.mxu0 }
 0x17c   : > { %v900_v27 = vmul.f32 0.17677669, %v580_v22  ;;  %v582_v28 = vadd.f32 %v581_v26, %v2052_v23  ;;  %v832_v29 = vpop.f32.mrf.mxu1 }
 0x17d   : > { %1000 = vst [vmem:[%s2132_s11 + $0xb8] sm:$0xff] %v838_v25  ;;  %v833_v30 = vadd.f32 %v832_v29, %v2120_v39  ;;  %v585_v31 = vpop.f32.mrf.mxu0 }
 0x17e   : > { %932 = vst [vmem:[%s2059_s28 + $0x98] sm:$0xff] %v900_v27  ;;  %964 = vst [vmem:[%s2064_s30 + $0x98] sm:$0xff] %v582_v28  ;;  %v586_v32 = vadd.f32 %v585_v31, %v2049_v0  ;;  %v1385_v33 = vpop.f32.mrf.mxu1 }
 0x17f   : > { %999 = vst [vmem:[%s2132_s11 + $0xb0] sm:$0xff] %v833_v30  ;;  %v848_v34 = vadd.f32 %v1385_v33, %v2120_v39  ;;  %v587_v35 = vpop.f32.mrf.mxu0 }
 0x180   : > { %v901_v36 = vmul.f32 0.17677669, %v586_v32  ;;  %v588_v37 = vadd.f32 %v587_v35, %v2052_v23  ;;  %v842_v19 = vpop.f32.mrf.mxu1 }
 0x181   : > { %1002 = vst [vmem:[%s2132_s11 + $0xc8] sm:$0xff] %v848_v34  ;;  %v843_v38 = vadd.f32 %v842_v19, %v2120_v39  ;;  %v591_v40 = vpop.f32.mrf.mxu0 }
 0x182   : > { %933 = vst [vmem:[%s2059_s28 + $0xa0] sm:$0xff] %v901_v36  ;;  %965 = vst [vmem:[%s2064_s30 + $0xa0] sm:$0xff] %v588_v37  ;;  %v592_v41 = vadd.f32 %v591_v40, %v2049_v0  ;;  %v1388_v42 = vpop.f32.mrf.mxu1 }
 0x183   : > { %1001 = vst [vmem:[%s2132_s11 + $0xc0] sm:$0xff] %v843_v38  ;;  %v858_v43 = vadd.f32 %v1388_v42, %v2120_v39  ;;  %v593_v44 = vpop.f32.mrf.mxu0 }
 0x184   : > { %v902_v45 = vmul.f32 0.17677669, %v592_v41  ;;  %v594_v46 = vadd.f32 %v593_v44, %v2052_v23  ;;  %v852_v47 = vpop.f32.mrf.mxu1 }
 0x185   : > { %1004 = vst [vmem:[%s2132_s11 + $0xd8] sm:$0xff] %v858_v43  ;;  %v853_v21 = vadd.f32 %v852_v47, %v2120_v39  ;;  %v597_v48 = vpop.f32.mrf.mxu0 }
 0x186   : > { %934 = vst [vmem:[%s2059_s28 + $0xa8] sm:$0xff] %v902_v45  ;;  %966 = vst [vmem:[%s2064_s30 + $0xa8] sm:$0xff] %v594_v46  ;;  %v598_v49 = vadd.f32 %v597_v48, %v2049_v0  ;;  %v1391_v50 = vpop.f32.mrf.mxu1 }
 0x187   : > { %1003 = vst [vmem:[%s2132_s11 + $0xd0] sm:$0xff] %v853_v21  ;;  %v868_v51 = vadd.f32 %v1391_v50, %v2120_v39  ;;  %v599_v52 = vpop.f32.mrf.mxu0 }
 0x188   : > { %v903_v53 = vmul.f32 0.17677669, %v598_v49  ;;  %v600_v54 = vadd.f32 %v599_v52, %v2052_v23  ;;  %v862_v55 = vpop.f32.mrf.mxu1 }
 0x189   : > { %1006 = vst [vmem:[%s2132_s11 + $0xe8] sm:$0xff] %v868_v51  ;;  %v863_v56 = vadd.f32 %v862_v55, %v2120_v39  ;;  %v603_v57 = vpop.f32.mrf.mxu0 }
 0x18a   : > { %935 = vst [vmem:[%s2059_s28 + $0xb0] sm:$0xff] %v903_v53  ;;  %967 = vst [vmem:[%s2064_s30 + $0xb0] sm:$0xff] %v600_v54  ;;  %v604_v58 = vadd.f32 %v603_v57, %v2049_v0  ;;  %v1394_v59 = vpop.f32.mrf.mxu1 }
 0x18b   : > { %1005 = vst [vmem:[%s2132_s11 + $0xe0] sm:$0xff] %v863_v56  ;;  %v878_v60 = vadd.f32 %v1394_v59, %v2120_v39  ;;  %v605_v61 = vpop.f32.mrf.mxu0 }
 0x18c   : > { %v904_v62 = vmul.f32 0.17677669, %v604_v58  ;;  %v606_v0 = vadd.f32 %v605_v61, %v2052_v23  ;;  %v872_v63 = vpop.f32.mrf.mxu1 }
 0x18d   : > { %1008 = vst [vmem:[%s2132_s11 + $0xf8] sm:$0xff] %v878_v60  ;;  %v873_v1 = vadd.f32 %v872_v63, %v2120_v39 }
 0x18e   : > { %936 = vst [vmem:[%s2059_s28 + $0xb8] sm:$0xff] %v904_v62  ;;  %968 = vst [vmem:[%s2064_s30 + $0xb8] sm:$0xff] %v606_v0  ;;  %s1593_s28 = scalar_lea.vmem %s1592_s7, 8192 }
 0x18f   : > { %1007 = vst [vmem:[%s2132_s11 + $0xf0] sm:$0xff] %v873_v1  ;;  %p1595_p3 = scmp.lt.s32.totalorder %s1593_s28, %s1587_s6 }
 0x191   : > { %p1596_p5 = por %p1595_p3, %p1594_p0 }
 0x193   : > { %p1597_p2 = pnand %p1596_p5, %p1590_p8 }
 0x195   : > { %1600 = shalt.err (!%p1597_p2)
}
 0x196   : > { %s1601_s26 = scalar_lea.hbm %s2261_s8, 4096  ;;  %s1605_s9 = scalar_lea.hbm %s2396_s4, 16384 }
 0x197   : > { %p1602_p6 = scmp.ne.s32.totalorder %s2261_s8, %s1601_s26  ;;  %p1606_p11 = scmp.lt.s32.totalorder %s2261_s8, %s2396_s4 }
 0x198   : > { %p1607_p10 = scmp.lt.s32.totalorder %s1605_s9, %s1601_s26 }
 0x199   : > { %p1603_p7 = pnand %p1602_p6, %p1873_p12 }
 0x19a   : > { %p1608_p13 = por %p1607_p10, %p1606_p11 }
 0x19b   : > { %p1604_p9 = pneg %p1603_p7 }
 0x19d   : > { %p1609_p1 = pnand %p1608_p13, %p1604_p9 }
 0x19f   : > { %1612 = shalt.err (!%p1609_p1)
}
 0x1a0   : > { %s1753_s12 = smov 128   ;;  %s1754_s6 = smov 8  }
 0x1a1   : > { %1434 = dma.vmem_to_hbm [thread:$0]  (%p1873_p12), %s2265_s22, 4096, %s2261_s8, %s2288_s29, %s1753_s12, %s1753_s12, %s1754_s6  }
 0x1a2   : > { %s1010_s23 = scalar_lea.sflag [#allocation4], %s1910_s18  ;;  %s1613_s7 = scalar_lea.vmem %s2274_s15, 4096 }
 0x1a3   : > { %p1614_p4 = scmp.ne.s32.totalorder %s2274_s15, %s1613_s7  ;;  %s1755_s28 = smov [#allocation7]  }
 0x1a4   : > { %s1617_s26 = sshll.u32 %s1755_s28, 4  ;;  %s1618_s26 = int_to_ptr.vmem [resolvable:$false] %s1617_s26 }
 0x1a5   : > { %p1615_p8 = pnand %p1614_p4, %p1873_p12  ;;  %s1619_s30 = scalar_lea.vmem %s1618_s26, 8192 }
 0x1a6   : > { %p1620_p3 = scmp.lt.s32.totalorder %s2274_s15, %s1618_s26  ;;  %p1621_p5 = scmp.lt.s32.totalorder %s1619_s30, %s1613_s7 }
 0x1a7   : > { %p1616_p0 = pneg %p1615_p8 }
 0x1a8   : > { %p1622_p2 = por %p1621_p5, %p1620_p3 }
 0x1aa   : > { %p1623_p6 = pnand %p1622_p2, %p1616_p0 }
 0x1ac   : > { %1626 = shalt.err (!%p1623_p6)
}
 0x1ad   : > { %s1627_s22 = scalar_lea.hbm %s2272_s1, 4096  ;;  %s1631_s11 = scalar_lea.hbm %s2420_s10, 16384 }
 0x1ae   : > { %p1628_p7 = scmp.ne.s32.totalorder %s2272_s1, %s1627_s22  ;;  %p1632_p10 = scmp.lt.s32.totalorder %s2272_s1, %s2420_s10 }
 0x1af   : > { %p1633_p13 = scmp.lt.s32.totalorder %s1631_s11, %s1627_s22 }
 0x1b0   : > { %p1629_p9 = pnand %p1628_p7, %p1873_p12 }
 0x1b1   : > { %p1634_p1 = por %p1633_p13, %p1632_p10 }
 0x1b2   : > { %p1630_p11 = pneg %p1629_p9 }
 0x1b4   : > { %p1635_p4 = pnand %p1634_p1, %p1630_p11 }
 0x1b6   : > { %1638 = shalt.err (!%p1635_p4)
}
 0x1b7   : > { %1433 = dma.vmem_to_hbm [thread:$0]  (%p1873_p12), %s2274_s15, 4096, %s2272_s1, %s1010_s23, %s1753_s12, %s1753_s12, %s1754_s6  }
 0x1b8   : > { %s1639_s5 = scalar_lea.vmem %s2283_s3, 4096  ;;  %s1756_s7 = smov [#allocation10]  }
 0x1b9   : > { %p1640_p8 = scmp.ne.s32.totalorder %s2283_s3, %s1639_s5  ;;  %s1643_s28 = sshll.u32 %s1756_s7, 4  ;;  %s1644_s28 = int_to_ptr.vmem [resolvable:$false] %s1643_s28 }
 0x1ba   : > { %s1645_s26 = scalar_lea.vmem %s1644_s28, 8192  ;;  %p1646_p5 = scmp.lt.s32.totalorder %s2283_s3, %s1644_s28 }
 0x1bb   : > { %p1641_p0 = pnand %p1640_p8, %p1873_p12  ;;  %p1647_p2 = scmp.lt.s32.totalorder %s1645_s26, %s1639_s5 }
 0x1bd   : > { %p1642_p3 = pneg %p1641_p0  ;;  %p1648_p6 = por %p1647_p2, %p1646_p5 }
 0x1bf   : > { %p1649_p7 = pnand %p1648_p6, %p1642_p3 }
 0x1c1   : > { %1652 = shalt.err (!%p1649_p7)
}
 0x1c2   : > { %s1653_s30 = scalar_lea.hbm %s2281_s27, 4096  ;;  %s1657_s23 = scalar_lea.hbm %s2421_s16, 16384 }
 0x1c3   : > { %p1654_p9 = scmp.ne.s32.totalorder %s2281_s27, %s1653_s30  ;;  %p1658_p13 = scmp.lt.s32.totalorder %s2281_s27, %s2421_s16 }
 0x1c4   : > { %p1659_p1 = scmp.lt.s32.totalorder %s1657_s23, %s1653_s30 }
 0x1c5   : > { %p1655_p11 = pnand %p1654_p9, %p1873_p12 }
 0x1c6   : > { %p1660_p4 = por %p1659_p1, %p1658_p13 }
 0x1c7   : > { %p1656_p10 = pneg %p1655_p11 }
 0x1c9   : > { %p1661_p8 = pnand %p1660_p4, %p1656_p10 }
 0x1cb   : > { %1664 = shalt.err (!%p1661_p8)
}
 0x1cc   : > { %1435 = dma.vmem_to_hbm [thread:$0]  (%p1873_p12), %s2283_s3, 4096, %s2281_s27, %s2288_s29, %s1753_s12, %s1753_s12, %s1754_s6  }
 0x1cd PF: > { %s2422_s8 = sld [smem:[#allocation15_spill]]  ;;  %p1460_p0 = scmp.ge.s32.totalorder %s1743_s25, 2 }
 0x1ce   : > { %s2423_s11 = sld [smem:[#allocation17_spill]] }
 0x1d3   : > { %s1086_s9 = sand.u32 1, %s2422_s8  }
 0x1d4   : > { %p2424_p3 = scmp.ne.s32.totalorder %s2423_s11, 0  ;;  %s1087_s21 = scalar_lea.sflag [#allocation4], %s1086_s9 }
 0x1d6   : > { %p1448_p5 = pnand %p1460_p0, %p2424_p3 }
 0x1d8   : > { %p1449_p2 = pneg %p1448_p5 }
 0x1da   : > { %1706 = dma.done.wait (%p1449_p2), %s1087_s21, 4096  }
 0x1db   : > { %1708 = vsyncadd (%p1449_p2), %s1087_s21, 4294963200  ;;  %s2425_s17 = sadd.s32 4294967294, %s1743_s25  }
 0x1dc   : > { %s1095_s5 = sand.u32 1, %s2425_s17  }
 0x1dd   : > { %s1096_s7 = scalar_lea.sflag [#allocation9], %s1095_s5 }
 0x1de   : > { %1710 = dma.done.wait (%p1449_p2), %s1096_s7, 8192  }
 0x1df   : > { %1712 = vsyncadd (%p1449_p2), %s1096_s7, 4294959104  ;;  %s26_s25 = sadd.s32 1, %s1743_s25   ;;  %s2426_s21 = sld [smem:[#allocation16_spill]] }
 0x1e0   : > { %p23_p12 = scmp.ge.s32.totalorder %s26_s25, 6   ;;  %s2427_s23 = sld [smem:[#allocation18_spill]] }
 0x1e1   : > { %s2428_s18 = smov %s1719_s19  ;;  %s2429_s19 = smov %s1723_s20 }
 0x1e2   : > { %s2430_s20 = smov %s1890_s13  ;;  %s2431_s22 = smov %s1739_s24 }
 0x1e3   : > { %s2432_s24 = smov %s2438_s14  ;;  %25 = sbr.rel (!%p23_p12) target bundleno = 14 (0xe), region = 113 }
 0x1e8   :  { %1110 = vsyncpa [#allocation3], 1 }
 0x1e9   :  { %1112 = vsyncpa [#allocation3 + $0x1], 1 }
 0x1ea   :  { %1113 = vsyncpa [#allocation6], 1 }
 0x1eb   :  { %1114 = vsyncpa [#allocation4], 1 }
 0x1ec   :  { %1116 = vsyncpa [#allocation4 + $0x1], 1 }
 0x1ed   :  { %1117 = vsyncpa [#allocation9], 1 }
 0x1ee   :  { %1119 = vsyncpa [#allocation9 + $0x1], 1 }

</bundles_post_ra>
